<compile_context>
chip_gen: v7x
topology: tpu7x:2x2x1
jax: 0.10.0
libtpu: 0.0.40
codegen_flags: <defaults>
</compile_context>

<pallas_src>
import functools

import jax
import jax.numpy as jnp
import numpy as np
from jax.experimental import pallas as pl
from jax.experimental.pallas import tpu as pltpu

_LANE = 128
_MAX_ROW_BLOCK = 512                     # row-tile cap for the streaming regime
_BLOCK_BYTES_SMALL = 4 * 1024 * 1024     # v7x / unknown: 2 in x 2 buf = 16 MiB
_BLOCK_BYTES_BIG = 8 * 1024 * 1024       # v5e/v6e (128 MiB VMEM): 32 MiB set
_VMEM_LIMIT_SMALL = 32 * 1024 * 1024
_VMEM_LIMIT_BIG = 64 * 1024 * 1024


def _tpu_traits():
    """(multi_tensorcore, big_vmem) from the device kind; conservative fallback."""
    kind = ""
    try:
        kind = jax.devices()[0].device_kind.lower()
    except Exception:
        pass
    multi_tc = any(s in kind for s in ("v7", "7x", "v4", "v5p"))
    big_vmem = (not multi_tc) and any(s in kind for s in ("v5", "v6"))
    return multi_tc, big_vmem


# ---------------------------------------------------------------------------
# Regime A: row-tiled, full-width blocks, no masks, no accumulators.
# ---------------------------------------------------------------------------
def _dice_rows_kernel(v1_ref, v2_ref, top_ref, s12_ref):
    v1 = v1_ref[...].astype(jnp.float32)
    v2 = v2_ref[...].astype(jnp.float32)
    top_ref[...] = jnp.sum(v1 * v2, axis=1, keepdims=True)
    s12_ref[...] = jnp.sum(v1 + v2, axis=1, keepdims=True)  # merged s1 + s2


# ---------------------------------------------------------------------------
# Regime B: column-streaming with resident accumulators and a gated tail mask.
# ---------------------------------------------------------------------------
def _dice_stream_kernel(v1_ref, v2_ref, top_ref, s12_ref, *,
                        tiles_per_split, tile_n, valid_n, needs_edge):
    t = pl.program_id(2)   # reduction over lane tiles (innermost)

    @pl.when(t == 0)
    def _init():
        top_ref[...] = jnp.zeros_like(top_ref)
        s12_ref[...] = jnp.zeros_like(s12_ref)

    def _accumulate(v1, v2):
        top_ref[...] += jnp.sum(v1 * v2, axis=1, keepdims=True)
        s12_ref[...] += jnp.sum(v1 + v2, axis=1, keepdims=True)

    if not needs_edge:
        # Static: no ragged tail and no duplicated tiles anywhere -> every
        # tile takes the unmasked fast path, no gating code emitted at all.
        _accumulate(v1_ref[...].astype(jnp.float32),
                    v2_ref[...].astype(jnp.float32))
        return

    p = pl.program_id(0)   # parallel split of the column-tile range
    start = (p * tiles_per_split + t) * tile_n
    is_interior = start + tile_n <= valid_n

    @pl.when(is_interior)
    def _fast():
        # Interior tile: no iota, no compares, no selects.
        _accumulate(v1_ref[...].astype(jnp.float32),
                    v2_ref[...].astype(jnp.float32))

    @pl.when(jnp.logical_not(is_interior))
    def _edge():
        # Ragged last real tile or clamped duplicate tile: cheap (1, TN) lane
        # iota, tile start folded into the bound; contribution of padded /
        # duplicated columns is exactly 0.
        lane = jax.lax.broadcasted_iota(jnp.int32, (1, tile_n), 1)
        valid = lane < (valid_n - start)
        v1 = jnp.where(valid, v1_ref[...].astype(jnp.float32), 0.0)
        v2 = jnp.where(valid, v2_ref[...].astype(jnp.float32), 0.0)
        _accumulate(v1, v2)


# ---------------------------------------------------------------------------
# Wrapper
# ---------------------------------------------------------------------------
def dice_loss(vol1, vol2, epsilon=1e-5, *, block_bytes=None, num_splits=None,
              force_streaming=False):
    assert vol1.shape == vol2.shape
    assert vol1.ndim >= 2
    B, C = vol1.shape[0], vol1.shape[1]
    R = B * C
    N = int(np.prod(vol1.shape[2:], dtype=np.int64))

    multi_tc, big_vmem = _tpu_traits()
    if block_bytes is None:
        block_bytes = _BLOCK_BYTES_BIG if big_vmem else _BLOCK_BYTES_SMALL
    vmem_limit = _VMEM_LIMIT_BIG if big_vmem else _VMEM_LIMIT_SMALL
    itemsize = np.dtype(vol1.dtype).itemsize

    # Free, contiguity-preserving reshape: NCHW -> (B*C, H*W).
    v1 = vol1.reshape(R, N)
    v2 = vol2.reshape(R, N)

    rows_fit = max(1, block_bytes // max(1, N * itemsize))
    use_rows = (N < _LANE) or ((not force_streaming) and rows_fit >= min(8, R))

    if use_rows:
        # ---- Regime A: row-tiled, reduce fully inside each (TR, N) block ----
        if R <= 8:
            TR = R
        else:
            TR = max(8, min((rows_fit // 8) * 8, ((R + 7) // 8) * 8))
        Rt = -(-R // TR)
        R_pad = Rt * TR   # rows >= R in the output are ignored by the epilogue

        out_top, out_s12 = pl.pallas_call(
            _dice_rows_kernel,
            out_shape=(jax.ShapeDtypeStruct((R_pad, 1), jnp.float32),
                       jax.ShapeDtypeStruct((R_pad, 1), jnp.float32)),
            grid=(Rt,),
            in_specs=[pl.BlockSpec((TR, N), lambda r: (r, 0)),
                      pl.BlockSpec((TR, N), lambda r: (r, 0))],
            out_specs=(pl.BlockSpec((TR, 1), lambda r: (r, 0)),
                       pl.BlockSpec((TR, 1), lambda r: (r, 0))),
            compiler_params=pltpu.CompilerParams(
                dimension_semantics=("parallel",),
                vmem_limit_bytes=vmem_limit),
        )(v1, v2)

        top = jnp.sum(out_top[:R, 0].reshape(B, C), axis=0)    # (C,)
        s12 = jnp.sum(out_s12[:R, 0].reshape(B, C), axis=0)    # (C,)
    else:
        # ---- Regime B: stream MiB-scale lane tiles, resident accumulators ----
        P = num_splits if num_splits is not None else (2 if multi_tc else 1)

        # Row tile: cap the block height so the working set stays bounded even
        # for huge B*C (max block = 512 * 128 * itemsize per buffer).
        TR = R if R <= 8 else min(((R + 7) // 8) * 8, _MAX_ROW_BLOCK)
        Rt = -(-R // TR)
        R_pad = Rt * TR

        cap = max(_LANE, (block_bytes // (TR * itemsize)) // _LANE * _LANE)
        TN = min(cap, (N // _LANE) * _LANE)      # multiple of 128, <= N
        NT = -(-N // TN)                         # real lane tiles covering N
        P = max(1, min(P, NT))
        T = -(-NT // P)                          # tiles per parallel split
        needs_edge = (P * T * TN) != N           # static: any ragged/duplicate?

        kernel = functools.partial(
            _dice_stream_kernel, tiles_per_split=T, tile_n=TN, valid_n=N,
            needs_edge=needs_edge)

        def in_idx(p, r, t):
            # Clamp so duplicated tail iterations stay in bounds; their
            # contribution is zeroed by the masked edge branch in the kernel.
            return (r, jnp.minimum(p * T + t, NT - 1))

        out_top, out_s12 = pl.pallas_call(
            kernel,
            out_shape=(jax.ShapeDtypeStruct((P, R_pad, 1), jnp.float32),
                       jax.ShapeDtypeStruct((P, R_pad, 1), jnp.float32)),
            grid=(P, Rt, T),
            in_specs=[pl.BlockSpec((TR, TN), in_idx),
                      pl.BlockSpec((TR, TN), in_idx)],
            out_specs=(pl.BlockSpec((None, TR, 1), lambda p, r, t: (p, r, 0)),
                       pl.BlockSpec((None, TR, 1), lambda p, r, t: (p, r, 0))),
            compiler_params=pltpu.CompilerParams(
                dimension_semantics=("parallel", "parallel", "arbitrary"),
                vmem_limit_bytes=vmem_limit),
        )(v1, v2)

        top = jnp.sum(out_top[:, :R, 0].reshape(P, B, C), axis=(0, 1))   # (C,)
        s12 = jnp.sum(out_s12[:, :R, 0].reshape(P, B, C), axis=(0, 1))   # (C,)

    # Tiny scalar epilogue: dice formula on (C,) per-channel sums.
    per_channel = -(2.0 * top) / jnp.maximum(s12, jnp.float32(epsilon))
    return jnp.mean(per_channel)


def _dice_loss_ref(vol1, vol2, epsilon=1e-5):
    C = vol1.shape[1]
    total = 0.0
    for i in range(C):
        top = 2.0 * jnp.sum(vol1[:, i] * vol2[:, i])
        bottom = jnp.sum(vol1[:, i]) + jnp.sum(vol2[:, i])
        bottom = jnp.maximum(bottom, epsilon)
        total += -(top / bottom)
    return total / C


if __name__ == "__main__":
    key = jax.random.PRNGKey(0)
    k1, k2, k3, k4 = jax.random.split(key, 4)

    # Primary NCHW shape (row-tiled regime A, single contiguous block).
    B, C, H, W = 2, 4, 16, 16
    vol1 = jax.random.uniform(k1, (B, C, H, W), dtype=jnp.float32)
    vol2 = jax.random.uniform(k2, (B, C, H, W), dtype=jnp.float32)
    loss = jax.block_until_ready(dice_loss(vol1, vol2))
    ref = jax.block_until_ready(_dice_loss_ref(vol1, vol2))
    np.testing.assert_allclose(np.asarray(loss), np.asarray(ref),
                               rtol=1e-5, atol=1e-6)

    # Ragged spatial extent (N = 120, R = 6): still regime A, no masks needed.
    B2, C2, H2, W2 = 2, 3, 10, 12
    u1 = jax.random.uniform(k3, (B2, C2, H2, W2), dtype=jnp.float32)
    u2 = jax.random.uniform(k4, (B2, C2, H2, W2), dtype=jnp.float32)
    loss2 = jax.block_until_ready(dice_loss(u1, u2))
    ref2 = jax.block_until_ready(_dice_loss_ref(u1, u2))
    np.testing.assert_allclose(np.asarray(loss2), np.asarray(ref2),
                               rtol=1e-5, atol=1e-6)

    # Exercise the streaming regime B on a small shape by forcing it with a
    # tiny block budget: TN=512 over N=1200 with P=2 -> interior fast tiles,
    # a ragged masked tile, a clamped duplicate tile, and the P-split merge.
    B3, C3, H3, W3 = 2, 3, 30, 40
    w1 = jax.random.uniform(k1, (B3, C3, H3, W3), dtype=jnp.float32)
    w2 = jax.random.uniform(k2, (B3, C3, H3, W3), dtype=jnp.float32)
    loss3 = jax.block_until_ready(
        dice_loss(w1, w2, force_streaming=True, block_bytes=12 * 1024,
                  num_splits=2))
    ref3 = jax.block_until_ready(_dice_loss_ref(w1, w2))
    np.testing.assert_allclose(np.asarray(loss3), np.asarray(ref3),
                               rtol=1e-5, atol=1e-6)

    print("KERNEL_OK")
</pallas_src>

<mosaic_0001>
module attributes {stable_mosaic.version = 11 : i64} {
  func.func @_dice_rows_kernel(%arg0: i32, %arg1: memref<8x256xf32, #tpu.memory_space<vmem>>, %arg2: memref<8x256xf32, #tpu.memory_space<vmem>>, %arg3: memref<8x1xf32, #tpu.memory_space<vmem>>, %arg4: memref<8x1xf32, #tpu.memory_space<vmem>>) attributes {dimension_semantics = [#tpu.dimension_semantics<parallel>], iteration_bounds = array<i64: 1>, scalar_prefetch = 0 : i64, scratch_operands = 0 : i64, tpu.core_type = #tpu.core_type<tc>, window_params = [{transform_indices = @transform_0, window_bounds = array<i64: 8, 256>}, {transform_indices = @transform_1, window_bounds = array<i64: 8, 256>}, {transform_indices = @transform_2, window_bounds = array<i64: 8, 1>}, {transform_indices = @transform_3, window_bounds = array<i64: 8, 1>}]} {
    %c0 = arith.constant 0 : index
    %c0_0 = arith.constant 0 : index
    %0 = vector.load %arg1[%c0, %c0_0] : memref<8x256xf32, #tpu.memory_space<vmem>>, vector<8x256xf32>
    %c0_1 = arith.constant 0 : index
    %c0_2 = arith.constant 0 : index
    %1 = vector.load %arg2[%c0_1, %c0_2] : memref<8x256xf32, #tpu.memory_space<vmem>>, vector<8x256xf32>
    %2 = arith.mulf %0, %1 : vector<8x256xf32>
    %cst = arith.constant dense<0.000000e+00> : vector<8xf32>
    %3 = vector.multi_reduction <add>, %2, %cst [1] : vector<8x256xf32> to vector<8xf32>
    %4 = vector.shape_cast %3 : vector<8xf32> to vector<8x1xf32>
    %c0_3 = arith.constant 0 : index
    %c0_4 = arith.constant 0 : index
    %5 = vector.load %arg3[%c0_3, %c0_4] : memref<8x1xf32, #tpu.memory_space<vmem>>, vector<8x1xf32>
    tpu.vector_store %arg3[%c0_3, %c0_4], %4 {strides = array<i32>} : memref<8x1xf32, #tpu.memory_space<vmem>>, vector<8x1xf32>,
    %6 = arith.addf %0, %1 : vector<8x256xf32>
    %cst_5 = arith.constant dense<0.000000e+00> : vector<8xf32>
    %7 = vector.multi_reduction <add>, %6, %cst_5 [1] : vector<8x256xf32> to vector<8xf32>
    %8 = vector.shape_cast %7 : vector<8xf32> to vector<8x1xf32>
    %c0_6 = arith.constant 0 : index
    %c0_7 = arith.constant 0 : index
    %9 = vector.load %arg4[%c0_6, %c0_7] : memref<8x1xf32, #tpu.memory_space<vmem>>, vector<8x1xf32>
    tpu.vector_store %arg4[%c0_6, %c0_7], %8 {strides = array<i32>} : memref<8x1xf32, #tpu.memory_space<vmem>>, vector<8x1xf32>,
    return
  }
  func.func @transform_0(%arg0: i32) -> (i32, i32) {
    %c0_i32 = arith.constant 0 : i32
    %c0_i32_0 = arith.constant 0 : i32
    return %arg0, %c0_i32 : i32, i32
  }
  func.func @transform_1(%arg0: i32) -> (i32, i32) {
    %c0_i32 = arith.constant 0 : i32
    %c0_i32_0 = arith.constant 0 : i32
    return %arg0, %c0_i32 : i32, i32
  }
  func.func @transform_2(%arg0: i32) -> (i32, i32) {
    %c0_i32 = arith.constant 0 : i32
    %c0_i32_0 = arith.constant 0 : i32
    return %arg0, %c0_i32 : i32, i32
  }
  func.func @transform_3(%arg0: i32) -> (i32, i32) {
    %c0_i32 = arith.constant 0 : i32
    %c0_i32_0 = arith.constant 0 : i32
    return %arg0, %c0_i32 : i32, i32
  }
}

</mosaic_0001>

<bundles_post_ra>
// kernel: tpu_custom_call.1
= control target key start
LH: loop header
LB: loop body
LE: loop exit
PB: predicated region body
PF: predicated region fallthrough
CT: control target
= control target key end

     0   :  { %9 = vsyncpa [#allocation3], 0  ;;  %s166_s0 = inlined_call_operand.hbm [shape: f32[8,256], index: 0, kind: input, shape index: {}]   ;;  %s167_s1 = inlined_call_operand.hbm [shape: f32[8,256], index: 1, kind: input, shape index: {}]   ;;  %s168_s2 = inlined_call_operand.vmem [shape: f32[8,1], index: 2, kind: output, shape index: {0}]   ;;  %s169_s3 = inlined_call_operand.vmem [shape: f32[8,1], index: 3, kind: output, shape index: {1}]  }
   0x1   :  { %10 = vsyncpa [#allocation5], 0  ;;  %s114_s12 = smov [#allocation2]   ;;  %s115_s14 = smov [#allocation4]  }
   0x2   :  { %s17_s13 = sshll.u32 %s114_s12, 4  ;;  %s27_s15 = sshll.u32 %s115_s14, 4  ;;  %s18_s13 = int_to_ptr.vmem [resolvable:$true] %s17_s13  ;;  %s28_s15 = int_to_ptr.vmem [resolvable:$true] %s27_s15 }
   0x3   :  { %s66_s18 = scalar_lea.hbm %s166_s0, 256 }
   0x4   :  { %p67_p0 = scmp.ne.s32.totalorder %s166_s0, %s66_s18  ;;  %p70_p1 = scmp.lt.u32.totalorder %s66_s18, %s166_s0 }
   0x6   :  { %p72_p2 = pnand %p70_p1, %p67_p0 }
   0x8   :  { %75 = shalt.err (!%p72_p2)
}
   0x9   :  { %s76_s23 = scalar_lea.vmem %s18_s13, 256  ;;  %p81_p4 = scmp.lt.s32.totalorder %s18_s13, %s18_s13 }
   0xa   :  { %p77_p3 = scmp.ne.s32.totalorder %s18_s13, %s76_s23  ;;  %p82_p5 = scmp.lt.s32.totalorder %s76_s23, %s76_s23 }
   0xc   :  { %p83_p6 = por %p82_p5, %p81_p4 }
   0xe   :  { %p84_p7 = pnand %p83_p6, %p77_p3 }
  0x10   :  { %87 = shalt.err (!%p84_p7)
}
  0x11   :  { %20 = dma.hbm_to_vmem [thread:$0]  %s166_s0, 256, %s18_s13, [#allocation3]  }
  0x12   :  { %s88_s28 = scalar_lea.hbm %s167_s1, 256 }
  0x13   :  { %p89_p8 = scmp.ne.s32.totalorder %s167_s1, %s88_s28  ;;  %p92_p9 = scmp.lt.u32.totalorder %s88_s28, %s167_s1 }
  0x15   :  { %p94_p10 = pnand %p92_p9, %p89_p8 }
  0x17   :  { %97 = shalt.err (!%p94_p10)
}
  0x18   :  { %s98_s6 = scalar_lea.vmem %s28_s15, 256  ;;  %p103_p12 = scmp.lt.s32.totalorder %s28_s15, %s28_s15 }
  0x19   :  { %p99_p11 = scmp.ne.s32.totalorder %s28_s15, %s98_s6  ;;  %p104_p13 = scmp.lt.s32.totalorder %s98_s6, %s98_s6 }
  0x1b   :  { %p105_p0 = por %p104_p13, %p103_p12 }
  0x1d   :  { %p106_p1 = pnand %p105_p0, %p99_p11 }
  0x1f   :  { %109 = shalt.err (!%p106_p1)
}
  0x20   :  { %30 = dma.hbm_to_vmem [thread:$0]  %s167_s1, 256, %s28_s15, [#allocation5]  }
  0x21   :  { %110 = dma.done.wait [#allocation3], 256  }
  0x22   :  { %111 = vsyncadd [#allocation3], 4294967040 }
  0x23   :  { %112 = dma.done.wait [#allocation5], 256  }
  0x24   :  { %113 = vsyncadd [#allocation5], 4294967040  ;;  %v37_v0 = vld [vmem:[#allocation2] sm:$0xff]  ;;  %v38_v1 = vld [vmem:[#allocation2 + $0x8] sm:$0xff]  ;;  %vm46_vm0 = vcmask 7168  }
  0x25   :  { %v39_v2 = vld [vmem:[#allocation4] sm:$0xff]  ;;  %v40_v3 = vld [vmem:[#allocation4 + $0x8] sm:$0xff] }
  0x26   :  { %v41_v4 = vmul.f32 %v39_v2, %v37_v0  ;;  %v42_v5 = vmul.f32 %v40_v3, %v38_v1  ;;  %v48_v6 = vadd.f32 %v39_v2, %v37_v0  ;;  %v49_v7 = vadd.f32 %v40_v3, %v38_v1 }
  0x28   :  { %v43_v8 = vadd.f32 %v42_v5, %v41_v4  ;;  %v50_v9 = vadd.f32 %v49_v7, %v48_v6 }
  0x2a   :  { %44 = vadd.xlane.f32.xlu0 %v43_v8 }
  0x2e   :  { %51 = vadd.xlane.f32.xlu0 %v50_v9 }
  0xb7   :  { %v45_v10 = vpop.xlane.xlu0 %44 }
  0xb8   :  { %47 = vst.msk [vmem:[%s168_s2] sm:$0xff] %vm46_vm0, %v45_v10 }
  0xbb   :  { %v52_v11 = vpop.xlane.xlu0 %51 }
  0xbc   :  { %53 = vst.msk [vmem:[%s169_s3] sm:$0xff] %vm46_vm0, %v52_v11 }
  0xbd   :  { %62 = vsyncpa [#allocation3], 1 }
  0xbe   :  { %63 = vsyncpa [#allocation5], 1 }

</bundles_post_ra>
